<compile_context>
chip_gen: v6e
topology: v6e:2x2x1
jax: 0.10.0
libtpu: 0.0.40
codegen_flags: <defaults>
</compile_context>

<pallas_src>
import functools
import math

import jax
import jax.numpy as jnp
from jax import lax
from jax.experimental import pallas as pl
from jax.experimental.pallas import tpu as pltpu


def _round_up(x: int, m: int) -> int:
    return (x + m - 1) // m * m


def _cdiv(a: int, b: int) -> int:
    return -(-a // b)


def _vmem_capacity_bytes() -> int:
    try:
        return int(pltpu.get_tpu_info().vmem_capacity_bytes)
    except Exception:
        return 64 << 20  # conservative default (v7x per-core VMEM)


def _embed_kernel(ids_ref, table_ref, out_ref, *, v_tile, scale):
    """One grid step: one-hot MXU gather of a chunk of token embeddings.

    ids_ref:   (T, 1)      int32 token ids for this chunk (VMEM)
    table_ref: (V_pad, D)  embedding table, VMEM-resident across all steps
    out_ref:   (T, D)      output block for this chunk
    """
    t, d = out_ref.shape
    v_pad = table_ref.shape[0]
    tdtype = table_ref.dtype
    ids = ids_ref[...]  # (T, 1) int32

    def onehot(v0):
        # onehot[r, c] = 1.0 iff ids[r] == v0 + c  (hot value 1.0 is exact in
        # any MXU input dtype, so the gather is numerically exact).
        col = lax.broadcasted_iota(jnp.int32, (t, v_tile), 1) + v0
        return (col == ids).astype(tdtype)

    if v_pad == v_tile:
        acc = jnp.dot(
            onehot(0),
            table_ref[...],
            precision=lax.Precision.HIGHEST,
            preferred_element_type=jnp.float32,
        )
    else:
        # Slice the vocab axis to bound the (T, v_tile) one-hot intermediate.
        def body(c, a):
            v0 = pl.multiple_of(c * v_tile, v_tile)
            return a + jnp.dot(
                onehot(v0),
                table_ref[pl.ds(v0, v_tile), :],
                precision=lax.Precision.HIGHEST,
                preferred_element_type=jnp.float32,
            )

        acc = lax.fori_loop(0, v_pad // v_tile, body, jnp.zeros((t, d), jnp.float32))

    # Fused sqrt(d_model) scale -> single dense store of the output block.
    out_ref[...] = (acc * scale).astype(out_ref.dtype)


@functools.partial(jax.jit, static_argnames=("block_bytes", "v_tile"))
def input_embeddings(
    token_ids: jax.Array,
    emb_table: jax.Array,
    *,
    block_bytes: int = 1 << 20,
    v_tile: int | None = None,
):
    """Pallas equivalent of InputEmbeddings.forward.

    token_ids: (B, S) int
    emb_table: (vocab_size, d_model)
    returns:   (B, S, d_model) in emb_table.dtype
    """
    B, S = token_ids.shape
    V, D = emb_table.shape
    scale = math.sqrt(float(D))
    out_dtype = emb_table.dtype
    itemsize = jnp.dtype(out_dtype).itemsize

    # ---- token-chunk size T: ~block_bytes per output block, multiple of 8,
    # and >= 2 grid steps when the input allows (v7x has 2 TensorCores).
    N = B * S
    t_cap = max(8, min(2048, block_bytes // max(1, D * itemsize)))
    t_cap = _round_up(t_cap, 8)
    if N >= 16:
        t_cap = min(t_cap, _round_up(_cdiv(N, 2), 8))
    else:
        t_cap = 8
    T = t_cap
    n_pad = _round_up(N, T)
    num_chunks = n_pad // T

    # ---- vocab tiling for the one-hot gather.
    if v_tile is None:
        v_tile_eff = _round_up(V, 8) if V <= 1024 else 1024
    else:
        v_tile_eff = _round_up(max(8, int(v_tile)), 8)
    v_pad = _round_up(V, v_tile_eff)
    table = emb_table
    if v_pad != V:
        table = jnp.pad(emb_table, ((0, v_pad - V), (0, 0)))  # zero rows, never selected

    # ---- token ids: flat, padded with id 0, delivered per chunk as (T, 1).
    flat_ids = token_ids.reshape(-1).astype(jnp.int32)
    if n_pad != N:
        flat_ids = jnp.pad(flat_ids, (0, n_pad - N))
    ids2d = flat_ids.reshape(n_pad, 1)

    # ---- VMEM budget, derived from the chip (64 MiB v7x / 128 MiB v5e,v6e).
    table_bytes = v_pad * D * itemsize
    out_block_bytes = T * D * itemsize
    ids_block_bytes = T * 128 * 4            # (T, 1) int32 block is lane-padded
    onehot_bytes = T * v_tile_eff * itemsize  # in-kernel intermediate
    acc_bytes = T * D * 4
    need = (
        2 * table_bytes                       # table is double-buffered by default
        + 2 * (out_block_bytes + ids_block_bytes)
        + onehot_bytes
        + acc_bytes
        + (4 << 20)                           # headroom
    )
    budget = int(0.75 * _vmem_capacity_bytes())
    if need > budget:
        # TODO(synk): manual DMA row-gather fallback for huge vocabularies.
        raise NotImplementedError(
            f"embedding table too large for the VMEM-resident kernel "
            f"(need ~{need >> 20} MiB, budget ~{budget >> 20} MiB)"
        )
    vmem_limit = int(min(max(need, 32 << 20), budget))

    kernel = functools.partial(_embed_kernel, v_tile=v_tile_eff, scale=scale)

    out_flat = pl.pallas_call(
        kernel,
        out_shape=jax.ShapeDtypeStruct((n_pad, D), out_dtype),
        grid=(num_chunks,),
        in_specs=[
            # Per-chunk token ids (VMEM block, pipelines with the output).
            pl.BlockSpec((T, 1), lambda i: (i, 0)),
            # Embedding table: full-extent block, constant index_map ->
            # DMA'd from HBM once and reused by every grid step.
            pl.BlockSpec((v_pad, D), lambda i: (0, 0)),
        ],
        out_specs=pl.BlockSpec((T, D), lambda i: (i, 0)),
        compiler_params=pltpu.CompilerParams(
            dimension_semantics=("parallel",),  # chunks are independent
            vmem_limit_bytes=vmem_limit,
        ),
    )(ids2d, table)

    if n_pad != N:
        out_flat = out_flat[:N]
    return out_flat.reshape(B, S, D)


if __name__ == "__main__":
    d_model = 128
    vocab_size = 64

    key = jax.random.PRNGKey(0)
    k_emb, k_ids1, k_ids2, k_emb3, k_ids3 = jax.random.split(key, 5)

    # Deterministic "parameters" (nn.Embedding weight ~ N(0,1) by default).
    emb_table = jax.random.normal(k_emb, (vocab_size, d_model), dtype=jnp.float32)

    # Case 1: small shapes from the module spec (batch=2, seq=8).
    token_ids = jax.random.randint(k_ids1, (2, 8), 0, vocab_size, dtype=jnp.int32)
    out = jax.block_until_ready(input_embeddings(token_ids, emb_table))
    ref = jnp.take(emb_table, token_ids, axis=0) * math.sqrt(float(d_model))
    assert out.shape == (2, 8, d_model), out.shape
    assert jnp.allclose(out, ref, atol=1e-5, rtol=1e-5), "mismatch vs reference (case 1)"

    # Case 2: multi-chunk grid with padding (N not a multiple of the chunk).
    token_ids2 = jax.random.randint(k_ids2, (4, 200), 0, vocab_size, dtype=jnp.int32)
    out2 = jax.block_until_ready(input_embeddings(token_ids2, emb_table))
    ref2 = jnp.take(emb_table, token_ids2, axis=0) * math.sqrt(float(d_model))
    assert out2.shape == (4, 200, d_model), out2.shape
    assert jnp.allclose(out2, ref2, atol=1e-5, rtol=1e-5), "mismatch vs reference (case 2)"

    # Case 3: vocab-sliced one-hot path (forced small v_tile, padded vocab).
    vocab3 = 160
    emb_table3 = jax.random.normal(k_emb3, (vocab3, d_model), dtype=jnp.float32)
    token_ids3 = jax.random.randint(k_ids3, (2, 56), 0, vocab3, dtype=jnp.int32)
    out3 = jax.block_until_ready(input_embeddings(token_ids3, emb_table3, v_tile=64))
    ref3 = jnp.take(emb_table3, token_ids3, axis=0) * math.sqrt(float(d_model))
    assert out3.shape == (2, 56, d_model), out3.shape
    assert jnp.allclose(out3, ref3, atol=1e-5, rtol=1e-5), "mismatch vs reference (case 3)"

    print("KERNEL_OK")
</pallas_src>

<mosaic_0001>
module attributes {stable_mosaic.version = 11 : i64} {
  func.func @_embed_kernel(%arg0: i32, %arg1: memref<8x1xi32, #tpu.memory_space<vmem>>, %arg2: memref<64x128xf32, #tpu.memory_space<vmem>>, %arg3: memref<8x128xf32, #tpu.memory_space<vmem>>) attributes {dimension_semantics = [#tpu.dimension_semantics<parallel>], iteration_bounds = array<i64: 2>, scalar_prefetch = 0 : i64, scratch_operands = 0 : i64, tpu.core_type = #tpu.core_type<tc>, window_params = [{transform_indices = @transform_0, window_bounds = array<i64: 8, 1>}, {pipeline_mode = #tpu.pipeline_mode<synchronous>, transform_indices = @transform_1, window_bounds = array<i64: 64, 128>}, {transform_indices = @transform_2, window_bounds = array<i64: 8, 128>}]} {
    %c0 = arith.constant 0 : index
    %c0_0 = arith.constant 0 : index
    %0 = vector.load %arg1[%c0, %c0_0] : memref<8x1xi32, #tpu.memory_space<vmem>>, vector<8x1xi32>
    %1 = tpu.iota {dimensions = array<i32: 1>} : vector<8x64xi32>
    %c0_i32 = arith.constant 0 : i32
    %2 = vector.broadcast %c0_i32 : i32 to vector<8x64xi32>
    %3 = arith.addi %1, %2 : vector<8x64xi32>
    %4 = vector.broadcast %0 : vector<8x1xi32> to vector<8x64xi32>
    %5 = arith.cmpi eq, %3, %4 : vector<8x64xi32>
    %6 = arith.extui %5 : vector<8x64xi1> to vector<8x64xi32>
    %7 = arith.sitofp %6 : vector<8x64xi32> to vector<8x64xf32>
    %c0_1 = arith.constant 0 : index
    %c0_2 = arith.constant 0 : index
    %8 = vector.load %arg2[%c0_1, %c0_2] : memref<64x128xf32, #tpu.memory_space<vmem>>, vector<64x128xf32>
    %cst = arith.constant dense<0.000000e+00> : vector<8x128xf32>
    %9 = tpu.matmul %7, %8, %cst {dimension_numbers = #tpu.dot_dimension_numbers<[1], [0], [0], [1], [0, 0, 1, 1], [], []>, precision = #tpu.contract_precision<fp32>} : vector<8x64xf32>, vector<64x128xf32>, vector<8x128xf32> -> vector<8x128xf32>
    %cst_3 = arith.constant 11.3137083 : f32
    %10 = vector.broadcast %cst_3 : f32 to vector<8x128xf32>
    %11 = arith.mulf %9, %10 : vector<8x128xf32>
    %c0_4 = arith.constant 0 : index
    %c0_5 = arith.constant 0 : index
    %12 = vector.load %arg3[%c0_4, %c0_5] : memref<8x128xf32, #tpu.memory_space<vmem>>, vector<8x128xf32>
    tpu.vector_store %arg3[%c0_4, %c0_5], %11 {strides = array<i32>} : memref<8x128xf32, #tpu.memory_space<vmem>>, vector<8x128xf32>,
    return
  }
  func.func @transform_0(%arg0: i32) -> (i32, i32) {
    %c0_i32 = arith.constant 0 : i32
    %c0_i32_0 = arith.constant 0 : i32
    return %arg0, %c0_i32 : i32, i32
  }
  func.func @transform_1(%arg0: i32) -> (i32, i32) {
    %c0_i32 = arith.constant 0 : i32
    %c0_i32_0 = arith.constant 0 : i32
    %c0_i32_1 = arith.constant 0 : i32
    return %c0_i32, %c0_i32_0 : i32, i32
  }
  func.func @transform_2(%arg0: i32) -> (i32, i32) {
    %c0_i32 = arith.constant 0 : i32
    %c0_i32_0 = arith.constant 0 : i32
    return %arg0, %c0_i32 : i32, i32
  }
}

</mosaic_0001>

<bundles_post_ra>
// kernel: input_embeddings.1
= control target key start
LH: loop header
LB: loop body
LE: loop exit
PB: predicated region body
PF: predicated region fallthrough
CT: control target
= control target key end

     0   :  { %7 = vsyncpa [#allocation3], 0  ;;  %s1449_s0 = inlined_call_operand.vmem [shape: s32[16,1], index: 0, kind: input, shape index: {}]   ;;  %s1450_s1 = inlined_call_operand.hbm [shape: f32[64,128], index: 1, kind: input, shape index: {}]   ;;  %s1451_s2 = inlined_call_operand.hbm [shape: f32[16,128], index: 2, kind: output, shape index: {}]  }
   0x1   :  { %8 = vsyncpa [#allocation4], 0 }
   0x2   :  { %10 = vsyncpa [#allocation4 + $0x1], 0  ;;  %s1153_s9 = smov 0   ;;  %s1155_s10 = smov 0  }
   0x3   :  { %s1157_s11 = smov 0   ;;  %s1159_s12 = smov 0  }
   0x4 LB: > { %s1174_s13 = sadd.s32 4294967295, %s1129_s12   ;;  %s799_s14 = sadd.s32 4294967294, %s1129_s12   ;;  %s1129_s12 = sphi %s1159_s12, %s1459_s12   ;;  %s1125_s11 = sphi %s1157_s11, %s1458_s11   ;;  %s1121_s10 = sphi %s1155_s10, %s1457_s10   ;;  %s1117_s9 = sphi %s1153_s9, %s1456_s9  }
   0x5   : > { %s1178_s15 = sadd.s32 1, %s1129_s12   ;;  %s70_s16 = sadd.s32 1, %s1125_s11 }
   0x6   : > { %s67_s17 = ssub.s32 %s1129_s12, %s1178_s15  ;;  %p80_p0 = scmp.ne.s32.totalorder %s1125_s11, %s1121_s10 }
   0x7   : > { %p68_p1 = scmp.eq.s32.totalorder %s67_s17, 0  ;;  %p81_p2 = scmp.eq.s32.totalorder %s1174_s13, 1 }
   0x8   : > { %p86_p3 = scmp.ne.s32.totalorder %s1121_s10, %s1117_s9  ;;  %p87_p4 = scmp.eq.s32.totalorder %s799_s14, 1 }
   0x9   : > { %s1189_s18 = scalar_select %p68_p1, %s1125_s11, %s70_s16  }
   0xa   : > { %p1191_p5 = por %p81_p2, %p80_p0  ;;  %p1195_p6 = por %p87_p4, %p86_p3 }
   0xb   : > { %p800_p7 = scmp.ge.s32.totalorder %s1129_s12, 1  ;;  %p94_p8 = scmp.lt.s32.totalorder %s1129_s12, 3 }
   0xc   : > { %s1453_s20 = scalar_select %p1195_p6, 1, 0 }
   0xd   : > { %p997_p9 = scmp.eq.s32.totalorder %s1174_s13, 0  ;;  %p1202_p10 = pnand %p800_p7, %p94_p8 }
   0xe   : > { %s1131_s22 = smov [#allocation2]  }
   0xf   : > { %s106_s23 = sshll.u32 %s1131_s22, 4  ;;  %p989_p11 = pneg %p1202_p10  ;;  %s107_s23 = int_to_ptr.vmem [resolvable:$true] %s106_s23 }
  0x10   : > { %s1050_s24 = scalar_lea.vmem %s107_s23, 1024  ;;  %p1058_p3 = scmp.lt.s32.totalorder %s107_s23, %s107_s23 }
  0x11   : > { %p990_p12 = pnand %p997_p9, %p989_p11  ;;  %p1051_p0 = scmp.ne.s32.totalorder %s107_s23, %s1050_s24 }
  0x12   : > { %p1059_p4 = scmp.lt.s32.totalorder %s1050_s24, %s1050_s24 }
  0x13   : > { %p1041_p13 = pneg %p990_p12 }
  0x14   : > { %p1060_p6 = por %p1059_p4, %p1058_p3 }
  0x15   : > { %p1053_p1 = pnand %p1051_p0, %p1041_p13 }
  0x17   : > { %p1054_p2 = pneg %p1053_p1 }
  0x19   : > { %p1061_p7 = pnand %p1060_p6, %p1054_p2 }
  0x1b   : > { %1064 = shalt.err (!%p1061_p7)
}
  0x1c   : > { %s1132_s25 = smov 128   ;;  %s1133_s26 = smov 8  }
  0x1d   : > { %992 = dma.hbm_to_vmem [thread:$0]  (!%p990_p12), %s1450_s1, 1024, %s107_s23, [#allocation3], %s1132_s25, %s1132_s25, %s1133_s26  }
  0x1e   : > { %129 = sbr.rel (%p1202_p10) target bundleno = 424 (0x1a8), region = 28 }
  0x23   : > { %1108 = dma.done.wait (%p997_p9), [#allocation3], 1024  }
  0x24   : > { %1110 = vsyncadd (%p997_p9), [#allocation3], 4294966272  ;;  %p150_p8 = scmp.lt.s32.totalorder %s1174_s13, 1  ;;  %v1134_v0 = vmov 0   ;;  %v1135_v1 = vmov 0.0   ;;  %vm1136_vm0 = vmmov 0   ;;  %v155_v51 = vlaneseq }
  0x25   : > { %1038 = vset.pattern.permute.xlu0 %v1134_v0  ;;  %888 = vmatprep.subr.mxu1 %v1135_v1  ;;  %v170_v3 = vld [vmem:[#allocation2 + $0x38] sm:$0xff]  ;;  %v169_v4 = vld [vmem:[#allocation2 + $0x30] sm:$0xff]  ;;  %v168_v7 = vld [vmem:[#allocation2 + $0x28] sm:$0xff]  ;;  %vm171_vm1 = vcmask 523264   ;;  %s147_s6 = sand.u32 1, %s1121_s10   ;;  %s812_s8 = sshll.u32 %s1174_s13, 7 }
  0x26   : > { %s151_s29 = scalar_select %p150_p8, %s1174_s13, 1  ;;  %869 = vmatprep.subr.mxu0 %v1135_v1  ;;  %904 = vmatprep.mubr.msk.f32.mxu1 %vm1136_vm0, %v1135_v1  ;;  %v1230_v5 = vand.u32 4294901760, %v170_v3  ;;  %v1232_v6 = vand.u32 4294901760, %v169_v4  ;;  %v167_v8 = vld [vmem:[#allocation2 + $0x20] sm:$0xff]  ;;  %v166_v9 = vld [vmem:[#allocation2 + $0x18] sm:$0xff]  ;;  %v1234_v10 = vand.u32 4294901760, %v168_v7 }
  0x27   : > { %885 = vmatprep.mubr.msk.f32.mxu0 %vm1136_vm0, %v1135_v1  ;;  %v1236_v11 = vand.u32 4294901760, %v167_v8  ;;  %v1238_v12 = vand.u32 4294901760, %v166_v9  ;;  %v165_v13 = vld [vmem:[#allocation2 + $0x10] sm:$0xff]  ;;  %v164_v14 = vld [vmem:[#allocation2 + $0x8] sm:$0xff]  ;;  %v163_v15 = vld [vmem:[#allocation2] sm:$0xff]  ;;  %v156_v52 = vand.u32 127, %v155_v51  ;;  %s726_s22 = scalar_lea.hbm %s1451_s2, %s812_s8 }
  0x28   : > { %s806_s30 = sshll.u32 %s151_s29, 3  ;;  %v1241_v16 = vsub.f32 %v170_v3, %v1230_v5  ;;  %v1244_v17 = vsub.f32 %v169_v4, %v1232_v6  ;;  %870 = vmatpush3.msra.mxu0 %v1230_v5  ;;  %v1247_v18 = vand.u32 4294901760, %v165_v13  ;;  %v1249_v19 = vand.u32 4294901760, %v164_v14  ;;  %s805_s7 = sshll.u32 %s147_s6, 3 }
  0x29   : > { %s153_s5 = scalar_lea.vmem %s1449_s0, %s806_s30  ;;  %v1252_v20 = vsub.f32 %v168_v7, %v1234_v10  ;;  %v1255_v21 = vsub.f32 %v167_v8, %v1236_v11  ;;  %v1258_v22 = vsub.f32 %v166_v9, %v1238_v12  ;;  %871 = vmatprep.subr.mxu0 %v1135_v1  ;;  %v1261_v23 = vand.u32 4294901760, %v163_v15  ;;  %s149_s14 = scalar_lea.vmem [#allocation5], %s805_s7 }
  0x2a   : > { %v154_v2 = vld [vmem:[%s153_s5] sm:$0xff]  ;;  %v277_v24 = vand.u32 4294901760, %v1241_v16  ;;  %v284_v25 = vand.u32 4294901760, %v1244_v17  ;;  %v1266_v26 = vsub.f32 %v165_v13, %v1247_v18  ;;  %872 = vmatpush3.msra.mxu0 %v1232_v6  ;;  %v1280_v32 = vsub.f32 %v164_v14, %v1249_v19  ;;  %s728_s16 = sshll.u32 %s149_s14, 4  ;;  %s715_s23 = scalar_lea.sflag [#allocation4], %s147_s6  ;;  %s729_s16 = int_to_ptr.vmem [resolvable:$true] %s728_s16 }
  0x2b   : > { %158 = vperm.xlu0 %1038, %v154_v2   ;;  %v291_v27 = vand.u32 4294901760, %v1252_v20  ;;  %v298_v28 = vand.u32 4294901760, %v1255_v21  ;;  %873 = vmatprep.subr.mxu0 %v1135_v1  ;;  %v305_v31 = vand.u32 4294901760, %v1258_v22  ;;  %v1288_v34 = vsub.f32 %v163_v15, %v1261_v23  ;;  %s1065_s24 = scalar_lea.vmem %s729_s16, 128  ;;  %s1137_s25 = smov [#allocation5]  }
  0x2c   : > { %v278_v29 = vsub.f32 %v1241_v16, %v277_v24  ;;  %v285_v30 = vsub.f32 %v1244_v17, %v284_v25  ;;  %874 = vmatpush3.msra.mxu0 %v1234_v10  ;;  %v312_v38 = vand.u32 4294901760, %v1266_v26  ;;  %v319_v41 = vand.u32 4294901760, %v1280_v32  ;;  %p1066_p6 = scmp.ne.s32.totalorder %s729_s16, %s1065_s24  ;;  %s1069_s26 = sshll.u32 %s1137_s25, 4  ;;  %s1070_s26 = int_to_ptr.vmem [resolvable:$false] %s1069_s26 }
  0x2d   : > { %v292_v33 = vsub.f32 %v1252_v20, %v291_v27  ;;  %875 = vmatprep.subr.mxu0 %v1135_v1  ;;  %v299_v37 = vsub.f32 %v1255_v21, %v298_v28  ;;  %v306_v40 = vsub.f32 %v1258_v22, %v305_v31  ;;  %v326_v44 = vand.u32 4294901760, %v1288_v34  ;;  %s1071_s13 = scalar_lea.vmem %s1070_s26, 256  ;;  %p1072_p11 = scmp.lt.s32.totalorder %s729_s16, %s1070_s26 }
  0x2e   : > { %v279_v35 = vand.u32 4294901760, %v278_v29  ;;  %v286_v36 = vand.u32 4294901760, %v285_v30  ;;  %876 = vmatpush3.msra.mxu0 %v1236_v11  ;;  %v313_v43 = vsub.f32 %v1266_v26, %v312_v38  ;;  %v320_v46 = vsub.f32 %v1280_v32, %v319_v41  ;;  %p1067_p9 = pnand %p1066_p6, %p1191_p5  ;;  %p1073_p12 = scmp.lt.s32.totalorder %s1071_s13, %s1065_s24 }
  0x2f   : > { %877 = vmatprep.subr.mxu0 %v1135_v1  ;;  %v293_v39 = vand.u32 4294901760, %v292_v33  ;;  %v300_v42 = vand.u32 4294901760, %v299_v37  ;;  %v307_v45 = vand.u32 4294901760, %v306_v40  ;;  %v327_v48 = vsub.f32 %v1288_v34, %v326_v44 }
  0x30   : > { %889 = vmatpush3.msra.mxu1 %v279_v35  ;;  %878 = vmatpush3.msra.mxu0 %v1238_v12  ;;  %v314_v47 = vand.u32 4294901760, %v313_v43  ;;  %v321_v49 = vand.u32 4294901760, %v320_v46  ;;  %p1068_p10 = pneg %p1067_p9  ;;  %p1074_p13 = por %p1073_p12, %p1072_p11 }
  0x31   : > { %890 = vmatprep.subr.mxu1 %v1135_v1  ;;  %879 = vmatprep.subr.mxu0 %v1135_v1  ;;  %v328_v50 = vand.u32 4294901760, %v327_v48 }
  0x32   : > { %891 = vmatpush3.msra.mxu1 %v286_v36  ;;  %880 = vmatpush3.msra.mxu0 %v1247_v18  ;;  %p1075_p0 = pnand %p1074_p13, %p1068_p10 }
  0x33   : > { %892 = vmatprep.subr.mxu1 %v1135_v1  ;;  %881 = vmatprep.subr.mxu0 %v1135_v1 }
  0x34   : > { %893 = vmatpush3.msra.mxu1 %v293_v39  ;;  %882 = vmatpush3.msra.mxu0 %v1249_v19 }
  0x35   : > { %894 = vmatprep.subr.mxu1 %v1135_v1  ;;  %883 = vmatprep.subr.mxu0 %v1135_v1 }
  0x36   : > { %895 = vmatpush3.msra.mxu1 %v300_v42  ;;  %884 = vmatpush3.msra.mxu0 %v1261_v23 }
  0x37   : > { %896 = vmatprep.subr.mxu1 %v1135_v1  ;;  %907 = vmatprep.subr.mxu0 %v1135_v1 }
  0x38   : > { %897 = vmatpush3.msra.mxu1 %v307_v45 }
  0x39   : > { %898 = vmatprep.subr.mxu1 %v1135_v1 }
  0x3a   : > { %899 = vmatpush3.msra.mxu1 %v314_v47 }
  0x3b   : > { %900 = vmatprep.subr.mxu1 %v1135_v1 }
  0x3c   : > { %901 = vmatpush3.msra.mxu1 %v321_v49 }
  0x3d   : > { %902 = vmatprep.subr.mxu1 %v1135_v1 }
  0x3e   : > { %903 = vmatpush3.msra.mxu1 %v328_v50 }
  0x3f   : > { %926 = vmatprep.subr.mxu1 %v1135_v1 }
  0xa6   : > { %v159_v53 = vpop.permute.xlu0 %158 }
  0xa7   : > { %vm160_vm2 = vcmp.eq.s32.totalorder %v156_v52, %v159_v53 }
  0xa8   : > { %v1327_v54 = vsel %vm160_vm2, 1.0, %v1135_v1 }
  0xa9   : > { %v173_v55 = vsel %vm171_vm1, %v1327_v54, 0  ;;  %905 = vmatmul.mubr.msk.f32.vlgmr.msra.gmra.mxu1 %vm171_vm1, %v1327_v54 }
  0xaa   : > { %v249_v56 = vsub.f32 %v173_v55, %v173_v55  ;;  %927 = vmatpush3.msra.mxu1 %v1230_v5  ;;  %942 = vmatprep.mubr.msk.f32.mxu1 %vm1136_vm0, %v1135_v1 }
  0xab   : > { %928 = vmatprep.subr.mxu1 %v1135_v1 }
  0xac   : > { %929 = vmatpush3.msra.mxu1 %v1232_v6  ;;  %v250_v57 = vand.u32 4294901760, %v249_v56 }
  0xad   : > { %930 = vmatprep.subr.mxu1 %v1135_v1 }
  0xae   : > { %931 = vmatpush3.msra.mxu1 %v1234_v10  ;;  %v251_v58 = vsub.f32 %v249_v56, %v250_v57 }
  0xaf   : > { %932 = vmatprep.subr.mxu1 %v1135_v1 }
  0xb0   : > { %933 = vmatpush3.msra.mxu1 %v1236_v11  ;;  %v252_v59 = vand.u32 4294901760, %v251_v58 }
  0xb1   : > { %934 = vmatprep.subr.mxu1 %v1135_v1 }
  0xb2   : > { %935 = vmatpush3.msra.mxu1 %v1238_v12  ;;  %886 = vmatmul.mubr.f32.vlgmr.msra.gmra.mxu0 %v252_v59 }
  0xb3   : > { %908 = vmatpush3.msra.mxu0 %v1241_v16  ;;  %936 = vmatprep.subr.mxu1 %v1135_v1 }
  0xb4   : > { %909 = vmatprep.subr.mxu0 %v1135_v1  ;;  %937 = vmatpush3.msra.mxu1 %v1247_v18 }
  0xb5   : > { %910 = vmatpush3.msra.mxu0 %v1244_v17  ;;  %938 = vmatprep.subr.mxu1 %v1135_v1 }
  0xb6   : > { %911 = vmatprep.subr.mxu0 %v1135_v1  ;;  %939 = vmatpush3.msra.mxu1 %v1249_v19 }
  0xb7   : > { %912 = vmatpush3.msra.mxu0 %v1252_v20  ;;  %940 = vmatprep.subr.mxu1 %v1135_v1 }
  0xb8   : > { %913 = vmatprep.subr.mxu0 %v1135_v1  ;;  %941 = vmatpush3.msra.mxu1 %v1261_v23 }
  0xb9   : > { %914 = vmatpush3.msra.mxu0 %v1255_v21  ;;  %943 = vmatmul.mubr.f32.vlgmr.msra.gmra.mxu1 %v250_v57 }
  0xba   : > { %964 = vmatprep.subr.mxu1 %v1135_v1  ;;  %915 = vmatprep.subr.mxu0 %v1135_v1 }
  0xbb   : > { %965 = vmatpush3.msra.mxu1 %v1230_v5  ;;  %916 = vmatpush3.msra.mxu0 %v1258_v22 }
  0xbc   : > { %966 = vmatprep.subr.mxu1 %v1135_v1  ;;  %917 = vmatprep.subr.mxu0 %v1135_v1 }
  0xbd   : > { %967 = vmatpush3.msra.mxu1 %v1232_v6  ;;  %918 = vmatpush3.msra.mxu0 %v1266_v26 }
  0xbe   : > { %968 = vmatprep.subr.mxu1 %v1135_v1  ;;  %919 = vmatprep.subr.mxu0 %v1135_v1 }
  0xbf   : > { %969 = vmatpush3.msra.mxu1 %v1234_v10  ;;  %920 = vmatpush3.msra.mxu0 %v1280_v32 }
  0xc0   : > { %970 = vmatprep.subr.mxu1 %v1135_v1  ;;  %921 = vmatprep.subr.mxu0 %v1135_v1 }
  0xc1   : > { %971 = vmatpush3.msra.mxu1 %v1236_v11  ;;  %922 = vmatpush3.msra.mxu0 %v1288_v34 }
  0xc2   : > { %923 = vmatprep.mubr.msk.f32.mxu0 %vm1136_vm0, %v1135_v1  ;;  %972 = vmatprep.subr.mxu1 %v1135_v1 }
  0xc3   : > { %924 = vmatmul.mubr.f32.vlgmr.msra.gmra.mxu0 %v249_v56  ;;  %945 = vmatprep.subr.mxu0 %v1135_v1 }
  0xc4   : > { %973 = vmatpush3.msra.mxu1 %v1238_v12  ;;  %946 = vmatpush3.msra.mxu0 %v277_v24 }
  0xc5   : > { %974 = vmatprep.subr.mxu1 %v1135_v1  ;;  %947 = vmatprep.subr.mxu0 %v1135_v1 }
  0xc6   : > { %975 = vmatpush3.msra.mxu1 %v1247_v18  ;;  %948 = vmatpush3.msra.mxu0 %v284_v25 }
  0xc7   : > { %976 = vmatprep.subr.mxu1 %v1135_v1  ;;  %949 = vmatprep.subr.mxu0 %v1135_v1 }
  0xc8   : > { %977 = vmatpush3.msra.mxu1 %v1249_v19  ;;  %950 = vmatpush3.msra.mxu0 %v291_v27 }
  0xc9   : > { %978 = vmatprep.subr.mxu1 %v1135_v1  ;;  %951 = vmatprep.subr.mxu0 %v1135_v1 }
  0xca   : > { %979 = vmatpush3.msra.mxu1 %v1261_v23  ;;  %980 = vmatprep.mubr.msk.f32.mxu1 %vm1136_vm0, %v1135_v1 }
  0xcb   : > { %952 = vmatpush3.msra.mxu0 %v298_v28  ;;  %981 = vmatmul.mubr.msk.f32.vlgmr.msra.gmra.mxu1 %vm171_vm1, %v1327_v54 }
  0xcc   : > { %953 = vmatprep.subr.mxu0 %v1135_v1  ;;  %961 = vmatprep.mubr.msk.f32.mxu0 %vm1136_vm0, %v1135_v1 }
  0xcd   : > { %954 = vmatpush3.msra.mxu0 %v305_v31 }
  0xce   : > { %955 = vmatprep.subr.mxu0 %v1135_v1 }
  0xcf   : > { %956 = vmatpush3.msra.mxu0 %v312_v38 }
  0xd0   : > { %957 = vmatprep.subr.mxu0 %v1135_v1 }
  0xd1   : > { %958 = vmatpush3.msra.mxu0 %v319_v41 }
  0xd2   : > { %959 = vmatprep.subr.mxu0 %v1135_v1 }
  0xd3   : > { %960 = vmatpush3.msra.mxu0 %v326_v44 }
  0xd4   : > { %962 = vmatmul.mubr.msk.f32.vlgmr.msra.gmra.mxu0 %vm171_vm1, %v1327_v54 }
 0x169   : > { %v365_v60 = vpop.f32.mrf.mxu1 }
 0x16b   : > { %v906_v61 = vpop.f32.mrf.mxu1 }
 0x172   : > { %v254_v62 = vpop.f32.mrf.mxu0 }
 0x173   : > { %v366_v6 = vadd.f32 %v365_v60, %v254_v62 }
 0x174   : > { %v887_v63 = vpop.f32.mrf.mxu0 }
 0x179   : > { %v534_v0 = vpop.f32.mrf.mxu1 }
 0x17b   : > { %v944_v2 = vpop.f32.mrf.mxu1 }
 0x183   : > { %v453_v3 = vpop.f32.mrf.mxu0 }
 0x184   : > { %v454_v1 = vadd.f32 %v453_v3, %v366_v6 }
 0x185   : > { %v925_v4 = vpop.f32.mrf.mxu0 }
 0x186   : > { %v535_v8 = vadd.f32 %v534_v0, %v454_v1 }
 0x18b   : > { %v708_v5 = vpop.f32.mrf.mxu1 }
 0x18d   : > { %v982_v7 = vpop.f32.mrf.mxu1 }
 0x194   : > { %v629_v9 = vpop.f32.mrf.mxu0 }
 0x195   : > { %v630_v10 = vadd.f32 %v629_v9, %v535_v8 }
 0x196   : > { %v963_v11 = vpop.f32.mrf.mxu0 }
 0x197   : > { %v709_v12 = vadd.f32 %v708_v5, %v630_v10 }
 0x199   : > { %v712_v13 = vmul.f32 11.313708, %v709_v12 }
 0x19b   : > { %713 = vst [vmem:[%s149_s14] sm:$0xff] %v712_v13 }
 0x19c   : > { %1078 = shalt.err (!%p1075_p0)
}
 0x19d   : > { %s1079_s27 = scalar_lea.hbm %s726_s22, 128  ;;  %s1083_s30 = scalar_lea.hbm %s1451_s2, 256 }
 0x19e   : > { %p1080_p1 = scmp.ne.s32.totalorder %s726_s22, %s1079_s27  ;;  %p1084_p4 = scmp.lt.s32.totalorder %s726_s22, %s1451_s2 }
 0x19f   : > { %p1085_p7 = scmp.lt.s32.totalorder %s1083_s30, %s1079_s27 }
 0x1a0   : > { %p1081_p2 = pnand %p1080_p1, %p1191_p5 }
 0x1a1   : > { %p1086_p8 = por %p1085_p7, %p1084_p4 }
 0x1a2   : > { %p1082_p3 = pneg %p1081_p2 }
 0x1a4   : > { %p1087_p6 = pnand %p1086_p8, %p1082_p3 }
 0x1a6   : > { %1090 = shalt.err (!%p1087_p6)
}
 0x1a7   : > { %987 = dma.vmem_to_hbm [thread:$0]  (%p1191_p5), %s729_s16, 128, %s726_s22, %s715_s23  }
 0x1a8 PF: > { %p999_p9 = scmp.ge.s32.totalorder %s1129_s12, 2  ;;  %s740_s5 = sand.u32 1, %s1117_s9  }
 0x1a9   : > { %p1455_p10 = scmp.ne.s32.totalorder %s1453_s20, 0  ;;  %s741_s6 = scalar_lea.sflag [#allocation4], %s740_s5 }
 0x1ab   : > { %p994_p11 = pnand %p999_p9, %p1455_p10 }
 0x1ad   : > { %p995_p12 = pneg %p994_p11 }
 0x1af   : > { %1112 = dma.done.wait (%p995_p12), %s741_s6, 128  }
 0x1b0   : > { %1114 = vsyncadd (%p995_p12), %s741_s6, 4294967168  ;;  %p13_p13 = scmp.ge.s32.totalorder %s1178_s15, 4   ;;  %s1456_s9 = smov %s1121_s10 }
 0x1b1   : > { %s1457_s10 = smov %s1125_s11  ;;  %s1458_s11 = smov %s1189_s18 }
 0x1b2   : > { %s1459_s12 = smov %s1178_s15  ;;  %15 = sbr.rel (!%p13_p13) target bundleno = 4 (0x4), region = 68 }
 0x1b7   :  { %746 = vsyncpa [#allocation3], 1 }
 0x1b8   :  { %748 = vsyncpa [#allocation3 + $0x1], 1 }
 0x1b9   :  { %749 = vsyncpa [#allocation4], 1 }
 0x1ba   :  { %751 = vsyncpa [#allocation4 + $0x1], 1 }

</bundles_post_ra>
